<compile_context>
chip_gen: v7x
topology: tpu7x:2x2x1
jax: 0.10.0
libtpu: 0.0.40
codegen_flags: <defaults>
</compile_context>

<pallas_src>
import jax
import jax.numpy as jnp
from jax.experimental import pallas as pl
from jax.experimental.pallas import tpu as pltpu


def _wce_kernel(logits_ref, labels_ref, weights_ref, num_ref, den_ref,
                acc_num, acc_den):
    i = pl.program_id(1)                               # inner reduction axis

    @pl.when(i == 0)
    def _():
        acc_num[...] = jnp.zeros_like(acc_num)
        acc_den[...] = jnp.zeros_like(acc_den)

    x = logits_ref[...].astype(jnp.float32)            # (TN, C) f32 math
    lbl = labels_ref[...]                              # (TN, 1) int32
    w = weights_ref[...].astype(jnp.float32)           # (1, C)
    tn, c = x.shape

    # numerically stable log-sum-exp over the class (lane) axis
    m = jnp.max(x, axis=-1, keepdims=True)             # (TN, 1)
    lse = m + jnp.log(jnp.sum(jnp.exp(x - m), axis=-1, keepdims=True))

    # fused one-hot gather with (1,C) iota and implicit broadcasts
    col = jax.lax.broadcasted_iota(jnp.int32, (1, c), 1)
    onehot = lbl == col                                 # (TN, C) bool
    picked_x = jnp.sum(jnp.where(onehot, x, 0.0), axis=-1, keepdims=True)
    wi = jnp.sum(jnp.where(onehot, w, 0.0), axis=-1, keepdims=True)

    # wi == 0 for padded / sentinel (-1) / out-of-range rows -> contribution 0.
    # The where() also discards NaN/inf produced by unspecified tail-row logits.
    contrib = jnp.where(wi != 0.0, wi * (lse - picked_x), 0.0)
    acc_num[...] += jnp.sum(contrib)
    acc_den[...] += jnp.sum(wi)

    @pl.when(i == pl.num_programs(1) - 1)
    def _():
        num_ref[...] = jnp.broadcast_to(acc_num[...], num_ref.shape)
        den_ref[...] = jnp.broadcast_to(acc_den[...], den_ref.shape)


def _device_info():
    """Return (vmem_capacity_bytes, num_tensorcores) with safe fallbacks."""
    kind = ""
    try:
        kind = jax.devices()[0].device_kind.lower()
    except Exception:
        pass
    vmem_cap = None
    try:
        vmem_cap = int(pltpu.get_tpu_info().vmem_capacity_bytes)
    except Exception:
        vmem_cap = None
    is_v7 = ("v7" in kind) or ("tpu7" in kind)
    if vmem_cap is None:
        vmem_cap = (64 << 20) if is_v7 else (128 << 20)
    # v7x (2 TC/chip) and megacore parts (v4/v5p) can split a "parallel" axis.
    two_cores = is_v7 or ("v5p" in kind) or ("v4" in kind)
    return vmem_cap, (2 if two_cores else 1)


def weighted_cross_entropy_loss(logits, labels, weights, *,
                                tile_n=None, num_chunks=None):
    """logits: (N, C) float (f32/bf16), labels: (N,) int, weights: (C,) float."""
    n, c = logits.shape
    dtype_bytes = jnp.dtype(logits.dtype).itemsize

    vmem_cap, n_cores = _device_info()
    small_vmem = vmem_cap <= (64 << 20)                 # v7x-class budget

    # ---- tile sizing: memory-bound kernel, pick big N-tiles (multiple of 8).
    # Budget includes the lane-padded (tile_n,1) int32 label buffer (512 B/row).
    if tile_n is None:
        budget_bytes = (2 << 20) if small_vmem else (4 << 20)
        per_row_bytes = c * dtype_bytes + 512
        tile_n = budget_bytes // max(1, per_row_bytes)
        tile_n = min(tile_n, 2048 if small_vmem else 4096)
    tile_n = min(tile_n, ((n + 7) // 8) * 8)
    tile_n = max(8, (tile_n // 8) * 8)

    total_tiles = pl.cdiv(n, tile_n)
    if num_chunks is None:
        num_chunks = n_cores if total_tiles >= n_cores else 1
    num_chunks = max(1, min(int(num_chunks), total_tiles))
    steps = pl.cdiv(total_tiles, num_chunks)
    n_pad = num_chunks * steps * tile_n

    # Pad ONLY the labels (tiny).  Sentinel -1 matches no class -> zero
    # contribution for padded rows and for the unspecified tail of ragged /
    # clamped logits tiles.  Logits are streamed unpadded in native dtype.
    labels_i32 = labels.astype(jnp.int32)
    if n_pad != n:
        labels_i32 = jnp.pad(labels_i32, (0, n_pad - n), constant_values=-1)
    labels2d = labels_i32.reshape(n_pad, 1)
    weights2d = weights.astype(jnp.float32).reshape(1, c)

    # VMEM budget: double-buffered logits + lane-padded labels + f32 temporaries.
    logits_buf = tile_n * c * dtype_bytes
    labels_buf = tile_n * 128 * 4
    f32_tmp = 3 * tile_n * c * 4
    vmem_limit = 2 * logits_buf + 2 * labels_buf + f32_tmp + (4 << 20)
    vmem_cap_budget = (36 << 20) if small_vmem else (64 << 20)
    vmem_limit = int(min(max(vmem_limit, 16 << 20), vmem_cap_budget))

    last_tile = total_tiles - 1  # clamp overshoot blocks (labels stay unclamped
    #                              and are -1 there, so no double counting)

    # TODO(synk): for extremely large C (vocab >> 128K) add a C-tiled inner axis
    # with an online logsumexp; here we simply shrink tile_n instead.
    # TODO(synk): if an xprof trace shows only one v7x TensorCore busy, switch
    # the chunk axis to pltpu.CORE_PARALLEL (or pl.core_map).
    num, den = pl.pallas_call(
        _wce_kernel,
        out_shape=(
            jax.ShapeDtypeStruct((num_chunks, 8, 128), jnp.float32),
            jax.ShapeDtypeStruct((num_chunks, 8, 128), jnp.float32),
        ),
        grid_spec=pltpu.PrefetchScalarGridSpec(
            num_scalar_prefetch=0,
            grid=(num_chunks, steps),
            in_specs=[
                pl.BlockSpec(
                    (tile_n, c),
                    lambda ci, si: (jnp.minimum(ci * steps + si, last_tile), 0)),
                pl.BlockSpec((tile_n, 1), lambda ci, si: (ci * steps + si, 0)),
                pl.BlockSpec((1, c), lambda ci, si: (0, 0)),
            ],
            out_specs=[
                pl.BlockSpec((1, 8, 128), lambda ci, si: (ci, 0, 0)),
                pl.BlockSpec((1, 8, 128), lambda ci, si: (ci, 0, 0)),
            ],
            scratch_shapes=[
                pltpu.VMEM((1, 1), jnp.float32),        # numerator accumulator
                pltpu.VMEM((1, 1), jnp.float32),        # denominator accumulator
            ],
        ),
        compiler_params=pltpu.CompilerParams(
            dimension_semantics=("parallel", "arbitrary"),
            vmem_limit_bytes=vmem_limit,
        ),
    )(logits, labels2d, weights2d)

    num_total = jnp.sum(num[:, 0, 0])
    den_total = jnp.sum(den[:, 0, 0])
    # final weighted mean (den == 0 -> nan, matching PyTorch behaviour)
    return (num_total / den_total).astype(jnp.float32)


def _reference(logits, labels, weights):
    # pure-JAX reference of nn.CrossEntropyLoss(weight=weights), reduction='mean'
    logp = jax.nn.log_softmax(logits.astype(jnp.float32), axis=-1)
    nll = -jnp.take_along_axis(logp, labels[:, None].astype(jnp.int32), axis=-1)[:, 0]
    w = weights.astype(jnp.float32)[labels]
    return jnp.sum(w * nll) / jnp.sum(w)


if __name__ == "__main__":
    key = jax.random.PRNGKey(0)
    k1, k2, k3, k4, k5, k6, k7 = jax.random.split(key, 7)

    # -- small demo shapes matching the module (logits (N, C), labels (N,))
    N, C = 16, 8
    logits = jax.random.normal(k1, (N, C), dtype=jnp.float32)
    labels = jax.random.randint(k2, (N,), 0, C, dtype=jnp.int32)
    weights = jax.random.uniform(k3, (C,), dtype=jnp.float32, minval=0.5, maxval=2.0)

    loss = jax.block_until_ready(weighted_cross_entropy_loss(logits, labels, weights))
    ref = _reference(logits, labels, weights)
    assert jnp.allclose(loss, ref, atol=1e-5, rtol=1e-5), (loss, ref)

    # -- bf16 case exercising multi-step accumulation, the 2-chunk axis and the
    #    unpadded-logits / sentinel-label masking of a ragged last tile.
    N2, C2 = 1000, 256
    logits2 = jax.random.normal(k4, (N2, C2), dtype=jnp.bfloat16)
    labels2 = jax.random.randint(k5, (N2,), 0, C2, dtype=jnp.int32)
    weights2 = jax.random.uniform(k3, (C2,), dtype=jnp.float32, minval=0.5, maxval=2.0)

    loss2 = jax.block_until_ready(
        weighted_cross_entropy_loss(logits2, labels2, weights2,
                                    tile_n=128, num_chunks=2))
    ref2 = _reference(logits2, labels2, weights2)
    assert jnp.allclose(loss2, ref2, atol=2e-4, rtol=2e-4), (loss2, ref2)

    # -- odd tile count with 2 chunks: exercises the clamped overshoot block
    #    (re-read logits tile masked by -1 sentinel labels -> no double count).
    N3, C3 = 20, 16
    logits3 = jax.random.normal(k6, (N3, C3), dtype=jnp.float32)
    labels3 = jax.random.randint(k7, (N3,), 0, C3, dtype=jnp.int32)
    weights3 = jax.random.uniform(k3, (C3,), dtype=jnp.float32, minval=0.5, maxval=2.0)

    loss3 = jax.block_until_ready(
        weighted_cross_entropy_loss(logits3, labels3, weights3,
                                    tile_n=8, num_chunks=2))
    ref3 = _reference(logits3, labels3, weights3)
    assert jnp.allclose(loss3, ref3, atol=1e-5, rtol=1e-5), (loss3, ref3)

    print("KERNEL_OK")
</pallas_src>

<mosaic_0001>
module attributes {stable_mosaic.version = 11 : i64} {
  func.func @_wce_kernel(%arg0: i32, %arg1: i32, %arg2: memref<16x8xf32, #tpu.memory_space<vmem>>, %arg3: memref<16x1xi32, #tpu.memory_space<vmem>>, %arg4: memref<1x8xf32, #tpu.memory_space<vmem>>, %arg5: memref<1x8x128xf32, #tpu.memory_space<vmem>>, %arg6: memref<1x8x128xf32, #tpu.memory_space<vmem>>, %arg7: memref<1x1xf32, #tpu.memory_space<vmem>>, %arg8: memref<1x1xf32, #tpu.memory_space<vmem>>) attributes {dimension_semantics = [#tpu.dimension_semantics<parallel>, #tpu.dimension_semantics<arbitrary>], iteration_bounds = array<i64: 1, 1>, scalar_prefetch = 0 : i64, scratch_operands = 2 : i64, tpu.core_type = #tpu.core_type<tc>, window_params = [{transform_indices = @transform_0, window_bounds = array<i64: 16, 8>}, {transform_indices = @transform_1, window_bounds = array<i64: 16, 1>}, {pipeline_mode = #tpu.pipeline_mode<synchronous>, transform_indices = @transform_2, window_bounds = array<i64: 1, 8>}, {transform_indices = @transform_3, window_bounds = array<i64: 1, 8, 128>}, {transform_indices = @transform_4, window_bounds = array<i64: 1, 8, 128>}]} {
    %c0_i32 = arith.constant 0 : i32
    %0 = arith.cmpi eq, %arg1, %c0_i32 : i32
    %1 = arith.extui %0 : i1 to i32
    %c0_i32_0 = arith.constant 0 : i32
    %2 = arith.cmpi ne, %1, %c0_i32_0 : i32
    scf.if %2 {
      %cst_25 = arith.constant 0.000000e+00 : f32
      %54 = vector.broadcast %cst_25 : f32 to vector<1x1xf32>
      %c0_26 = arith.constant 0 : index
      %c0_27 = arith.constant 0 : index
      %55 = vector.load %arg7[%c0_26, %c0_27] : memref<1x1xf32, #tpu.memory_space<vmem>>, vector<1x1xf32>
      tpu.vector_store %arg7[%c0_26, %c0_27], %54 {strides = array<i32>} : memref<1x1xf32, #tpu.memory_space<vmem>>, vector<1x1xf32>,
      %cst_28 = arith.constant 0.000000e+00 : f32
      %56 = vector.broadcast %cst_28 : f32 to vector<1x1xf32>
      %c0_29 = arith.constant 0 : index
      %c0_30 = arith.constant 0 : index
      %57 = vector.load %arg8[%c0_29, %c0_30] : memref<1x1xf32, #tpu.memory_space<vmem>>, vector<1x1xf32>
      tpu.vector_store %arg8[%c0_29, %c0_30], %56 {strides = array<i32>} : memref<1x1xf32, #tpu.memory_space<vmem>>, vector<1x1xf32>,
    } else {
    }
    %c0 = arith.constant 0 : index
    %c0_1 = arith.constant 0 : index
    %3 = vector.load %arg2[%c0, %c0_1] : memref<16x8xf32, #tpu.memory_space<vmem>>, vector<16x8xf32>
    %c0_2 = arith.constant 0 : index
    %c0_3 = arith.constant 0 : index
    %4 = vector.load %arg3[%c0_2, %c0_3] : memref<16x1xi32, #tpu.memory_space<vmem>>, vector<16x1xi32>
    %c0_4 = arith.constant 0 : index
    %c0_5 = arith.constant 0 : index
    %5 = vector.load %arg4[%c0_4, %c0_5] : memref<1x8xf32, #tpu.memory_space<vmem>>, vector<1x8xf32>
    %cst = arith.constant dense<0xFF800000> : vector<16xf32>
    %6 = vector.multi_reduction <maximumf>, %3, %cst [1] : vector<16x8xf32> to vector<16xf32>
    %7 = vector.shape_cast %6 : vector<16xf32> to vector<16x1xf32>
    %8 = vector.broadcast %7 : vector<16x1xf32> to vector<16x8xf32>
    %9 = arith.subf %3, %8 : vector<16x8xf32>
    %10 = math.exp %9 : vector<16x8xf32>
    %cst_6 = arith.constant dense<0.000000e+00> : vector<16xf32>
    %11 = vector.multi_reduction <add>, %10, %cst_6 [1] : vector<16x8xf32> to vector<16xf32>
    %12 = vector.shape_cast %11 : vector<16xf32> to vector<16x1xf32>
    %13 = math.log %12 : vector<16x1xf32>
    %14 = arith.addf %7, %13 : vector<16x1xf32>
    %15 = tpu.iota {dimensions = array<i32: 1>} : vector<1x8xi32>
    %16 = vector.broadcast %4 : vector<16x1xi32> to vector<16x8xi32>
    %17 = vector.broadcast %15 : vector<1x8xi32> to vector<16x8xi32>
    %18 = arith.cmpi eq, %16, %17 : vector<16x8xi32>
    %cst_7 = arith.constant 0.000000e+00 : f32
    %19 = vector.broadcast %cst_7 : f32 to vector<16x8xf32>
    %20 = arith.select %18, %3, %19 : vector<16x8xi1>, vector<16x8xf32>
    %cst_8 = arith.constant dense<0.000000e+00> : vector<16xf32>
    %21 = vector.multi_reduction <add>, %20, %cst_8 [1] : vector<16x8xf32> to vector<16xf32>
    %22 = vector.shape_cast %21 : vector<16xf32> to vector<16x1xf32>
    %cst_9 = arith.constant 0.000000e+00 : f32
    %23 = vector.shape_cast %5 : vector<1x8xf32> to vector<1x8xf32>
    %24 = vector.broadcast %23 : vector<1x8xf32> to vector<16x8xf32>
    %25 = vector.broadcast %cst_9 : f32 to vector<16x8xf32>
    %26 = arith.select %18, %24, %25 : vector<16x8xi1>, vector<16x8xf32>
    %cst_10 = arith.constant dense<0.000000e+00> : vector<16xf32>
    %27 = vector.multi_reduction <add>, %26, %cst_10 [1] : vector<16x8xf32> to vector<16xf32>
    %28 = vector.shape_cast %27 : vector<16xf32> to vector<16x1xf32>
    %cst_11 = arith.constant 0.000000e+00 : f32
    %29 = vector.broadcast %cst_11 : f32 to vector<16x1xf32>
    %30 = arith.cmpf one, %28, %29 : vector<16x1xf32>
    %31 = arith.subf %14, %22 : vector<16x1xf32>
    %32 = arith.mulf %28, %31 : vector<16x1xf32>
    %cst_12 = arith.constant 0.000000e+00 : f32
    %33 = vector.broadcast %cst_12 : f32 to vector<16x1xf32>
    %34 = arith.select %30, %32, %33 : vector<16x1xi1>, vector<16x1xf32>
    %c0_13 = arith.constant 0 : index
    %c0_14 = arith.constant 0 : index
    %35 = vector.load %arg7[%c0_13, %c0_14] : memref<1x1xf32, #tpu.memory_space<vmem>>, vector<1x1xf32>
    %36 = vector.shape_cast %34 : vector<16x1xf32> to vector<1x16x1xf32>
    %cst_15 = arith.constant dense<0.000000e+00> : vector<1xf32>
    %37 = vector.multi_reduction <add>, %36, %cst_15 [1, 2] : vector<1x16x1xf32> to vector<1xf32>
    %38 = vector.shape_cast %37 : vector<1xf32> to vector<1x1x1xf32>
    %39 = vector.extract %38[0, 0, 0] : f32 from vector<1x1x1xf32>
    %40 = vector.broadcast %39 : f32 to vector<1x1xf32>
    %41 = arith.addf %35, %40 : vector<1x1xf32>
    %c0_16 = arith.constant 0 : index
    %c0_17 = arith.constant 0 : index
    %42 = vector.load %arg7[%c0_16, %c0_17] : memref<1x1xf32, #tpu.memory_space<vmem>>, vector<1x1xf32>
    tpu.vector_store %arg7[%c0_16, %c0_17], %41 {strides = array<i32>} : memref<1x1xf32, #tpu.memory_space<vmem>>, vector<1x1xf32>,
    %c0_18 = arith.constant 0 : index
    %c0_19 = arith.constant 0 : index
    %43 = vector.load %arg8[%c0_18, %c0_19] : memref<1x1xf32, #tpu.memory_space<vmem>>, vector<1x1xf32>
    %44 = vector.shape_cast %28 : vector<16x1xf32> to vector<1x16x1xf32>
    %cst_20 = arith.constant dense<0.000000e+00> : vector<1xf32>
    %45 = vector.multi_reduction <add>, %44, %cst_20 [1, 2] : vector<1x16x1xf32> to vector<1xf32>
    %46 = vector.shape_cast %45 : vector<1xf32> to vector<1x1x1xf32>
    %47 = vector.extract %46[0, 0, 0] : f32 from vector<1x1x1xf32>
    %48 = vector.broadcast %47 : f32 to vector<1x1xf32>
    %49 = arith.addf %43, %48 : vector<1x1xf32>
    %c0_21 = arith.constant 0 : index
    %c0_22 = arith.constant 0 : index
    %50 = vector.load %arg8[%c0_21, %c0_22] : memref<1x1xf32, #tpu.memory_space<vmem>>, vector<1x1xf32>
    tpu.vector_store %arg8[%c0_21, %c0_22], %49 {strides = array<i32>} : memref<1x1xf32, #tpu.memory_space<vmem>>, vector<1x1xf32>,
    %c0_i32_23 = arith.constant 0 : i32
    %51 = arith.cmpi eq, %arg1, %c0_i32_23 : i32
    %52 = arith.extui %51 : i1 to i32
    %c0_i32_24 = arith.constant 0 : i32
    %53 = arith.cmpi ne, %52, %c0_i32_24 : i32
    scf.if %53 {
      %c0_25 = arith.constant 0 : index
      %c0_26 = arith.constant 0 : index
      %54 = vector.load %arg7[%c0_25, %c0_26] : memref<1x1xf32, #tpu.memory_space<vmem>>, vector<1x1xf32>
      %55 = vector.shape_cast %54 : vector<1x1xf32> to vector<1x1x1xf32>
      %56 = vector.broadcast %55 : vector<1x1x1xf32> to vector<1x8x128xf32>
      %c0_27 = arith.constant 0 : index
      %c0_28 = arith.constant 0 : index
      %c0_29 = arith.constant 0 : index
      %57 = vector.load %arg5[%c0_27, %c0_28, %c0_29] : memref<1x8x128xf32, #tpu.memory_space<vmem>>, vector<1x8x128xf32>
      tpu.vector_store %arg5[%c0_27, %c0_28, %c0_29], %56 {strides = array<i32>} : memref<1x8x128xf32, #tpu.memory_space<vmem>>, vector<1x8x128xf32>,
      %c0_30 = arith.constant 0 : index
      %c0_31 = arith.constant 0 : index
      %58 = vector.load %arg8[%c0_30, %c0_31] : memref<1x1xf32, #tpu.memory_space<vmem>>, vector<1x1xf32>
      %59 = vector.shape_cast %58 : vector<1x1xf32> to vector<1x1x1xf32>
      %60 = vector.broadcast %59 : vector<1x1x1xf32> to vector<1x8x128xf32>
      %c0_32 = arith.constant 0 : index
      %c0_33 = arith.constant 0 : index
      %c0_34 = arith.constant 0 : index
      %61 = vector.load %arg6[%c0_32, %c0_33, %c0_34] : memref<1x8x128xf32, #tpu.memory_space<vmem>>, vector<1x8x128xf32>
      tpu.vector_store %arg6[%c0_32, %c0_33, %c0_34], %60 {strides = array<i32>} : memref<1x8x128xf32, #tpu.memory_space<vmem>>, vector<1x8x128xf32>,
    } else {
    }
    return
  }
  func.func @transform_0(%arg0: i32, %arg1: i32) -> (i32, i32) {
    %c1_i32 = arith.constant 1 : i32
    %0 = arith.muli %arg0, %c1_i32 : i32
    %1 = arith.addi %0, %arg1 : i32
    %c0_i32 = arith.constant 0 : i32
    %2 = arith.minsi %1, %c0_i32 : i32
    %c0_i32_0 = arith.constant 0 : i32
    %c0_i32_1 = arith.constant 0 : i32
    return %2, %c0_i32_0 : i32, i32
  }
  func.func @transform_1(%arg0: i32, %arg1: i32) -> (i32, i32) {
    %c1_i32 = arith.constant 1 : i32
    %0 = arith.muli %arg0, %c1_i32 : i32
    %1 = arith.addi %0, %arg1 : i32
    %c0_i32 = arith.constant 0 : i32
    %c0_i32_0 = arith.constant 0 : i32
    return %1, %c0_i32 : i32, i32
  }
  func.func @transform_2(%arg0: i32, %arg1: i32) -> (i32, i32) {
    %c0_i32 = arith.constant 0 : i32
    %c0_i32_0 = arith.constant 0 : i32
    %c0_i32_1 = arith.constant 0 : i32
    return %c0_i32, %c0_i32_0 : i32, i32
  }
  func.func @transform_3(%arg0: i32, %arg1: i32) -> (i32, i32, i32) {
    %c0_i32 = arith.constant 0 : i32
    %c0_i32_0 = arith.constant 0 : i32
    %c0_i32_1 = arith.constant 0 : i32
    return %arg0, %c0_i32, %c0_i32_0 : i32, i32, i32
  }
  func.func @transform_4(%arg0: i32, %arg1: i32) -> (i32, i32, i32) {
    %c0_i32 = arith.constant 0 : i32
    %c0_i32_0 = arith.constant 0 : i32
    %c0_i32_1 = arith.constant 0 : i32
    return %arg0, %c0_i32, %c0_i32_0 : i32, i32, i32
  }
}

</mosaic_0001>

<bundles_post_ra>
// kernel: tpu_custom_call.1
= control target key start
LH: loop header
LB: loop body
LE: loop exit
PB: predicated region body
PF: predicated region fallthrough
CT: control target
= control target key end

     0   :  { %10 = vsyncpa [#allocation5], 0  ;;  %vm84_vm0 = vcmask 64512   ;;  %v317_v4 = vmov 0   ;;  %s399_s0 = inlined_call_operand.vmem [shape: f32[16,8], index: 0, kind: input, shape index: {}]   ;;  %s400_s1 = inlined_call_operand.vmem [shape: s32[16,1], index: 1, kind: input, shape index: {}]   ;;  %s401_s2 = inlined_call_operand.vmem [shape: f32[1,8], index: 2, kind: input, shape index: {}]   ;;  %s402_s3 = inlined_call_operand.hbm [shape: f32[1,8,128], index: 3, kind: output, shape index: {0}]   ;;  %s403_s4 = inlined_call_operand.hbm [shape: f32[1,8,128], index: 4, kind: output, shape index: {1}]  }
   0x1   :  { %v79_v0 = vld [vmem:[%s399_s0] sm:$0xff]  ;;  %v80_v1 = vld [vmem:[%s399_s0 + $0x8] sm:$0xff]  ;;  %259 = vset.pattern.permute.xlu1 %v317_v4  ;;  %260 = vset.pattern.permute.xlu0 %v317_v4 }
   0x2   :  { %v81_v2 = vld [vmem:[%s400_s1] sm:$0xff]  ;;  %v85_v3 = vsel %vm84_vm0, %v79_v0, -inf }
   0x3   :  { %11 = vsyncpa [#allocation7], 0  ;;  %86 = vmax.xlane.f32.xlu0 %v85_v3  ;;  %112 = vperm.xlu1 %259, %v81_v2   ;;  %v88_v5 = vsel %vm84_vm0, %v80_v1, -inf  ;;  %v82_v6 = vld [vmem:[%s400_s1 + $0x8] sm:$0xff]  ;;  %v109_v11 = vlaneseq  ;;  %v248_v25 = vld [vmem:[%s401_s2] ss:$0 sm:$0xff] }
   0x4   :  { %vm150_vm5 = vcmask 7168   ;;  %vm76_vm6 = vcmask 0   ;;  %v318_v54 = vmov 0.0   ;;  %s319_s24 = smov [#allocation4]   ;;  %s320_s26 = smov [#allocation6]  }
   0x5   :  { %v110_v15 = vand.u32 127, %v109_v11  ;;  %77 = vst.msk [vmem:[#allocation2] sm:$0x1] %vm76_vm6, %v318_v54  ;;  %78 = vst.msk [vmem:[#allocation3] sm:$0x1] %vm76_vm6, %v318_v54  ;;  %s214_s25 = sshll.u32 %s319_s24, 4  ;;  %s215_s25 = int_to_ptr.vmem [resolvable:$true] %s214_s25 }
   0x6   :  { %s224_s27 = sshll.u32 %s320_s26, 4  ;;  %s269_s28 = scalar_lea.vmem %s215_s25, 128  ;;  %s225_s27 = int_to_ptr.vmem [resolvable:$true] %s224_s27 }
   0x7   :  { %89 = vmax.xlane.f32.xlu0 %v88_v5  ;;  %115 = vperm.xlu1 %259, %v82_v6   ;;  %p270_p0 = scmp.ne.s32.totalorder %s215_s25, %s269_s28  ;;  %p274_p1 = scmp.lt.s32.totalorder %s215_s25, %s215_s25 }
   0x8   :  { %p275_p2 = scmp.lt.s32.totalorder %s269_s28, %s269_s28 }
   0xa   :  { %p276_p3 = por %p275_p2, %p274_p1 }
   0xc   :  { %v149_v5 = vld [vmem:[#allocation2] sm:$0x1]  ;;  %p277_p4 = pnand %p276_p3, %p270_p0 }
  0x82   :  { %v113_v14 = vpop.permute.xlu1 %112 }
  0x83   :  { %vm117_vm1 = vcmp.eq.s32.totalorder %v113_v14, %v110_v15 }
  0x84   :  { %v119_v18 = vsel %vm117_vm1, %v79_v0, 0.0  ;;  %v133_v26 = vsel %vm117_vm1, %v248_v25, 0.0 }
  0x85   :  { %v121_v20 = vsel %vm84_vm0, %v119_v18, 0.0  ;;  %v135_v27 = vsel %vm84_vm0, %v133_v26, 0.0 }
  0x86   :  { %v116_v16 = vpop.permute.xlu1 %115 }
  0x87   :  { %vm118_vm2 = vcmp.eq.s32.totalorder %v116_v16, %v110_v15 }
  0x88   :  { %v120_v22 = vsel %vm118_vm2, %v80_v1, 0.0  ;;  %v134_v28 = vsel %vm118_vm2, %v248_v25, 0.0 }
  0x89   :  { %v124_v24 = vsel %vm84_vm0, %v120_v22, 0.0  ;;  %v138_v29 = vsel %vm84_vm0, %v134_v28, 0.0 }
  0x90   :  { %v87_v7 = vpop.xlane.xlu0 %86 }
  0x91   :  { %v91_v8 = vsub.f32 %v79_v0, %v87_v7 }
  0x93   :  { %v93_v9 = vmul.f32 1.442695, %v91_v8  ;;  %v167_v8 = vld [vmem:[#allocation3] sm:$0x1] }
  0x94   :  { %v90_v10 = vpop.xlane.xlu0 %89 }
  0x95   :  { %261 = vpow2.f32 %v93_v9  ;;  %v92_v12 = vsub.f32 %v80_v1, %v90_v10 }
  0x97   :  { %v95_v13 = vmul.f32 1.442695, %v92_v12 }
  0x99   :  { %263 = vpow2.f32 %v95_v13 }
  0x9f   :  { %v262_v17 = vpop.eup %261 }
  0xa0   :  { %v97_v19 = vsel %vm84_vm0, %v262_v17, 0.0 }
  0xa1   :  { %98 = vadd.xlane.f32.xlu0 %v97_v19 }
  0xa3   :  { %v264_v21 = vpop.eup %263 }
  0xa4   :  { %v100_v23 = vsel %vm84_vm0, %v264_v21, 0.0 }
  0xa5   :  { %122 = vadd.xlane.f32.xlu0 %v121_v20  ;;  %101 = vadd.xlane.f32.xlu1 %v100_v23 }
  0xa9   :  { %125 = vadd.xlane.f32.xlu0 %v124_v24 }
  0xad   :  { %136 = vadd.xlane.f32.xlu0 %v135_v27 }
  0xb1   :  { %139 = vadd.xlane.f32.xlu0 %v138_v29 }
 0x12e   :  { %v99_v30 = vpop.xlane.xlu0 %98 }
 0x12f   :  { %265 = vlog2.f32 %v99_v30 }
 0x132   :  { %v102_v31 = vpop.xlane.xlu1 %101  ;;  %v123_v32 = vpop.xlane.xlu0 %122 }
 0x133   :  { %267 = vlog2.f32 %v102_v31 }
 0x136   :  { %v126_v33 = vpop.xlane.xlu0 %125 }
 0x139   :  { %v266_v34 = vpop.eup %265 }
 0x13a   :  { %v104_v35 = vmul.f32 0.6931472, %v266_v34  ;;  %v137_v37 = vpop.xlane.xlu0 %136 }
 0x13b   :  { %vm141_vm3 = vcmp.ne.f32.partialorder %v137_v37, 0.0  ;;  %v168_v52 = vsel %vm150_vm5, %v137_v37, 0.0 }
 0x13c   :  { %v107_v36 = vadd.f32 %v104_v35, %v87_v7 }
 0x13d   :  { %v268_v38 = vpop.eup %267 }
 0x13e   :  { %v106_v39 = vmul.f32 0.6931472, %v268_v38  ;;  %v143_v40 = vsub.f32 %v107_v36, %v123_v32  ;;  %v140_v44 = vpop.xlane.xlu0 %139 }
 0x13f   :  { %vm142_vm4 = vcmp.ne.f32.partialorder %v140_v44, 0.0  ;;  %v169_v51 = vsel %vm150_vm5, %v140_v44, 0.0 }
 0x140   :  { %v108_v41 = vadd.f32 %v106_v39, %v90_v10  ;;  %v145_v42 = vmul.f32 %v143_v40, %v137_v37  ;;  %v170_v53 = vadd.f32 %v169_v51, %v168_v52 }
 0x142   :  { %v144_v43 = vsub.f32 %v108_v41, %v126_v33  ;;  %v147_v46 = vsel %vm141_vm3, %v145_v42, 0.0 }
 0x143   :  { %v151_v48 = vsel %vm150_vm5, %v147_v46, 0.0 }
 0x144   :  { %v146_v45 = vmul.f32 %v144_v43, %v140_v44 }
 0x146   :  { %v148_v47 = vsel %vm142_vm4, %v146_v45, 0.0 }
 0x147   :  { %v152_v49 = vsel %vm150_vm5, %v148_v47, 0.0 }
 0x148   :  { %v153_v50 = vadd.f32 %v152_v49, %v151_v48 }
 0x14a   :  { %154 = vadd.xlane.f32.xlu0 %v153_v50 }
 0x14e   :  { %171 = vadd.xlane.f32.xlu0 %v170_v53 }
 0x1d7   :  { %v155_v55 = vpop.xlane.xlu0 %154 }
 0x1d8   :  { %v156_v56 = vrot.slane %v155_v55, 4 }
 0x1da   :  { %v157_v57 = vadd.f32 %v156_v56, %v155_v55 }
 0x1db   :  { %v172_v58 = vpop.xlane.xlu0 %171 }
 0x1dc   :  { %v158_v59 = vrot.slane %v157_v57, 2  ;;  %v173_v60 = vrot.slane %v172_v58, 4 }
 0x1de   :  { %v174_v61 = vadd.f32 %v173_v60, %v172_v58  ;;  %v159_v62 = vadd.f32 %v158_v59, %v157_v57 }
 0x1e0   :  { %v175_v63 = vrot.slane %v174_v61, 2  ;;  %v160_v0 = vrot.slane %v159_v62, 1 }
 0x1e2   :  { %v161_v1 = vadd.f32 %v160_v0, %v159_v62  ;;  %v176_v2 = vadd.f32 %v175_v63, %v174_v61 }
 0x1e4   :  { %251 = vpush %v161_v1  ;;  %v177_v3 = vrot.slane %v176_v2, 1 }
 0x1e6   :  { %v178_v4 = vadd.f32 %v177_v3, %v176_v2 }
 0x1e8   :  { %253 = vpush %v178_v4 }
 0x215   :  { %s252_s2 = spop %251 }
 0x216   :  { %v163_v6 = vstv %s252_s2 }
 0x217   :  { %v164_v7 = vadd.f32 %v163_v6, %v149_v5 }
 0x219   :  { %166 = vst.msk [vmem:[#allocation2] sm:$0x1] %vm76_vm6, %v164_v7  ;;  %s254_s23 = spop %253 }
 0x21a   :  { %v180_v9 = vstv %s254_s23 }
 0x21b   :  { %v181_v10 = vadd.f32 %v180_v9, %v167_v8 }
 0x21d   :  { %182 = vst.msk [vmem:[#allocation3] sm:$0x1] %vm76_vm6, %v181_v10 }
 0x220   :  { %v249_v11 = vld [vmem:[#allocation2] ss:$0 sm:$0xff] }
 0x221   :  { %193 = vperm.xlu0 %260, %v249_v11  }
 0x224   :  { %v250_v12 = vld [vmem:[#allocation3] ss:$0 sm:$0xff] }
 0x225   :  { %204 = vperm.xlu1 %259, %v250_v12  }
 0x2a0   :  { %v194_v13 = vpop.permute.xlu0 %193 }
 0x2a1   :  { %196 = vst [vmem:[#allocation4] sm:$0xff] %v194_v13 }
 0x2a2   :  { %280 = shalt.err (!%p277_p4)
}
 0x2a3   :  { %s281_s5 = scalar_lea.hbm %s402_s3, 128 }
 0x2a4   :  { %p282_p5 = scmp.ne.s32.totalorder %s402_s3, %s281_s5  ;;  %p285_p6 = scmp.lt.u32.totalorder %s281_s5, %s402_s3 }
 0x2a6   :  { %p287_p7 = pnand %p285_p6, %p282_p5 }
 0x2a8   :  { %290 = shalt.err (!%p287_p7)
}
 0x2a9   :  { %217 = dma.vmem_to_hbm [thread:$0]  %s215_s25, 128, %s402_s3, [#allocation5]   ;;  %v205_v14 = vpop.permute.xlu1 %204 }
 0x2aa   :  { %207 = vst [vmem:[#allocation6] sm:$0xff] %v205_v14  ;;  %s291_s12 = scalar_lea.vmem %s225_s27, 128  ;;  %p296_p9 = scmp.lt.s32.totalorder %s225_s27, %s225_s27 }
 0x2ab   :  { %p292_p8 = scmp.ne.s32.totalorder %s225_s27, %s291_s12  ;;  %p297_p10 = scmp.lt.s32.totalorder %s291_s12, %s291_s12 }
 0x2ad   :  { %p298_p11 = por %p297_p10, %p296_p9 }
 0x2af   :  { %p299_p12 = pnand %p298_p11, %p292_p8 }
 0x2b1   :  { %302 = shalt.err (!%p299_p12)
}
 0x2b2   :  { %s303_s15 = scalar_lea.hbm %s403_s4, 128 }
 0x2b3   :  { %p304_p13 = scmp.ne.s32.totalorder %s403_s4, %s303_s15  ;;  %p307_p0 = scmp.lt.u32.totalorder %s303_s15, %s403_s4 }
 0x2b5   :  { %p309_p1 = pnand %p307_p0, %p304_p13 }
 0x2b7   :  { %312 = shalt.err (!%p309_p1)
}
 0x2b8   :  { %227 = dma.vmem_to_hbm [thread:$0]  %s225_s27, 128, %s403_s4, [#allocation7]  }
 0x2b9   :  { %313 = dma.done.wait [#allocation5], 128  }
 0x2ba   :  { %314 = vsyncadd [#allocation5], 4294967168 }
 0x2bb   :  { %315 = dma.done.wait [#allocation7], 128  }
 0x2bc   :  { %316 = vsyncadd [#allocation7], 4294967168 }
 0x2bd   :  { %234 = vsyncpa [#allocation5], 1 }
 0x2be   :  { %235 = vsyncpa [#allocation7], 1 }

</bundles_post_ra>
